<compile_context>
chip_gen: v5e
topology: v5e:2x2
jax: 0.10.0
libtpu: 0.0.40
codegen_flags: <defaults>
</compile_context>

<pallas_src>
import functools

import numpy as np
import jax
import jax.numpy as jnp
from jax.experimental import pallas as pl
from jax.experimental.pallas import tpu as pltpu

K = 3
EPS = 1e-5
VMEM_LIMIT = 48 * 1024 * 1024   # fits v7x's 64 MiB with headroom; plenty for v5e/v6e


# --------------------------------------------------------------------------------------
# Pallas kernels
# --------------------------------------------------------------------------------------
def _conv_bn_stats_kernel(x_ref, wb_ref, bias_ref, *rest, affine_relu_input):
    """One batch image of:
         [optional fused BN affine + ReLU on the input] -> conv(k=3,s=1,p=1) as a single
         merged banded matmul -> + bias, plus per-lane sum / sum-of-squares for BatchNorm.

    x_ref:      (Hpk, L)      per-batch row-packed activations (lane = p*W*C + w*C + c)
    wb_ref:     (3*L, Lout)   merged banded weights (bf16), resident across the grid
    bias_ref:   (1, Lout)     conv bias tiled over (p, w) lanes (f32)
    iscale_ref: (1, L)        [optional] BN scale of the input  (gamma * rsqrt(var+eps))
    ishift_ref: (1, L)        [optional] BN shift of the input  (beta - mean*scale)
    z_ref:      (Hpk, Lout)   pre-BN conv output (bf16 stream to HBM)
    ssum_ref:   (1, Lout)     per-batch per-lane sum        (f32)
    ssq_ref:    (1, Lout)     per-batch per-lane sum(x^2)   (f32)
    """
    if affine_relu_input:
        iscale_ref, ishift_ref, z_ref, ssum_ref, ssq_ref = rest
    else:
        z_ref, ssum_ref, ssq_ref = rest

    xs = x_ref[...].astype(jnp.float32)                        # (Hpk, L)
    if affine_relu_input:
        # Fused BatchNorm affine + ReLU of the previous conv (f32 elementwise math).
        xs = jnp.maximum(xs * iscale_ref[...] + ishift_ref[...], 0.0)

    # Row halo built in registers: the inserted zero rows are exactly the conv's implicit
    # zero padding along H (inserted *after* the affine, so padding stays exactly zero).
    zero_row = jnp.zeros_like(xs[:1])
    above = jnp.concatenate([zero_row, xs[:-1]], axis=0)       # packed row r-1
    below = jnp.concatenate([xs[1:], zero_row], axis=0)        # packed row r+1

    # Merge the 3 vertical band taps along the contraction dim -> one deep MXU matmul.
    ys3 = jnp.concatenate([above, xs, below], axis=-1).astype(jnp.bfloat16)   # (Hpk, 3L)
    acc = jnp.dot(ys3, wb_ref[...], preferred_element_type=jnp.float32) + bias_ref[...]

    z_ref[...] = acc.astype(z_ref.dtype)

    # Per-batch BatchNorm statistics (per lane); per-channel fold happens in the wrapper.
    ssum_ref[...] = jnp.sum(acc, axis=0, keepdims=True)
    ssq_ref[...] = jnp.sum(acc * acc, axis=0, keepdims=True)


def _affine_residual_kernel(z_ref, scale_ref, shift_ref, res_ref, o_ref):
    """Final BatchNorm affine + residual add:  o = z*scale + shift + res  (f32)."""
    o_ref[...] = (z_ref[...].astype(jnp.float32) * scale_ref[...]
                  + shift_ref[...] + res_ref[...])


# --------------------------------------------------------------------------------------
# pallas_call wrappers
# --------------------------------------------------------------------------------------
def _conv_bn_stats(x_rows, wband, bias, iscale=None, ishift=None):
    """conv(k=3,s=1,p=1) + bias (+ optional fused input BN affine + ReLU) + BN statistics."""
    N, Hpk, L = x_rows.shape
    KL, Lout = wband.shape
    affine = iscale is not None
    kernel = functools.partial(_conv_bn_stats_kernel, affine_relu_input=affine)

    in_specs = [
        # Whole per-batch image per grid step (tiny here; row-tiling only needed for huge H).
        pl.BlockSpec((None, Hpk, L), lambda n: (n, 0, 0)),
        # Merged banded weight + bias: constant block index -> resident across the grid.
        # TODO(synk): for large W*C, switch to a plain (TH*W, 9C)@(9C, Cout) tile matmul and
        # pipeline_mode=pl.Buffered(1) on these constant inputs (banded weight grows as W^2).
        pl.BlockSpec((KL, Lout), lambda n: (0, 0)),
        pl.BlockSpec((1, Lout), lambda n: (0, 0)),
    ]
    args = [x_rows, wband, bias]
    if affine:
        vec = pl.BlockSpec((1, L), lambda n: (0, 0))
        in_specs += [vec, vec]
        args += [iscale, ishift]

    outs = (
        jax.ShapeDtypeStruct((N, Hpk, Lout), jnp.bfloat16),   # z: pre-BN conv output (bf16)
        jax.ShapeDtypeStruct((N, 1, Lout), jnp.float32),      # per-batch per-lane sum
        jax.ShapeDtypeStruct((N, 1, Lout), jnp.float32),      # per-batch per-lane sum(x^2)
    )
    out_specs = (
        pl.BlockSpec((None, Hpk, Lout), lambda n: (n, 0, 0)),
        pl.BlockSpec((None, 1, Lout), lambda n: (n, 0, 0)),   # per-batch -> no revisiting
        pl.BlockSpec((None, 1, Lout), lambda n: (n, 0, 0)),
    )

    flops = int(2 * N * Hpk * KL * Lout)
    bytes_accessed = int(sum(a.size * a.dtype.itemsize for a in args)
                         + sum(int(np.prod(o.shape)) * np.dtype(o.dtype).itemsize
                               for o in outs))

    return pl.pallas_call(
        kernel,
        out_shape=outs,
        grid=(N,),
        in_specs=in_specs,
        out_specs=out_specs,
        compiler_params=pltpu.CompilerParams(
            # All outputs are per-batch blocks -> the grid axis is genuinely parallel
            # (v7x megacore sharding; no-op on v5e/v6e).
            dimension_semantics=("parallel",),
            vmem_limit_bytes=VMEM_LIMIT,
        ),
        cost_estimate=pl.CostEstimate(flops=flops, transcendentals=0,
                                      bytes_accessed=bytes_accessed),
    )(*args)


def _affine_residual(z, scale, shift, res):
    N, Hpk, L = res.shape
    blk_z = pl.BlockSpec((None, Hpk, z.shape[-1]), lambda n: (n, 0, 0))
    blk = pl.BlockSpec((None, Hpk, L), lambda n: (n, 0, 0))
    vec = pl.BlockSpec((1, L), lambda n: (0, 0))
    bytes_accessed = int(z.size * z.dtype.itemsize + 2 * res.size * 4 + 2 * L * 4)
    return pl.pallas_call(
        _affine_residual_kernel,
        out_shape=jax.ShapeDtypeStruct((N, Hpk, L), jnp.float32),
        grid=(N,),
        in_specs=[blk_z, vec, vec, blk],
        out_specs=blk,
        # Output aliases the f32 residual buffer (same shape/dtype): one fewer HBM stream.
        input_output_aliases={3: 0},
        compiler_params=pltpu.CompilerParams(
            dimension_semantics=("parallel",),
            vmem_limit_bytes=VMEM_LIMIT,
        ),
        cost_estimate=pl.CostEstimate(flops=int(3 * N * Hpk * L), transcendentals=0,
                                      bytes_accessed=bytes_accessed),
    )(z, scale, shift, res)


# --------------------------------------------------------------------------------------
# Parameter massaging (tiny, wrapper-side; shapes are static so it traces cleanly)
# --------------------------------------------------------------------------------------
def _pick_pack(H, W, C):
    """Pack P rows per sublane row so the lane dim P*W*C reaches >=128 (dense stores)."""
    P = 1
    while P * W * C < 128 and H % (2 * P) == 0:
        P *= 2
    return P


def _banded_weight(w_pt, W, P):
    """ConvTranspose2d weight (Cin, Cout, 3, 3) -> merged banded matmul weight
    of shape (3*P*W*Cin, P*W*Cout) for the row-packed (N, H/P, P*W*C) layout.

    ConvTranspose2d(k=3,s=1,p=1) equals a same-size conv with the spatially flipped
    kernel: wflip[kh,kw,ci,co] = w[ci,co,2-kh,2-kw].  Band db in {0,1,2} consumes the
    packed input row r_out + db - 1; horizontal taps, W zero-padding and the P-row
    packing live in the band structure, so the activations are never expanded or padded.
    """
    Cin, Cout = w_pt.shape[0], w_pt.shape[1]
    wflip = jnp.transpose(w_pt[:, :, ::-1, ::-1], (2, 3, 0, 1))        # (kh, kw, Cin, Cout)
    db = np.arange(K).reshape(K, 1, 1, 1, 1, 1, 1)
    pi = np.arange(P).reshape(1, P, 1, 1, 1, 1, 1)
    wi = np.arange(W).reshape(1, 1, W, 1, 1, 1, 1)
    po = np.arange(P).reshape(1, 1, 1, P, 1, 1, 1)
    wo = np.arange(W).reshape(1, 1, 1, 1, W, 1, 1)
    kh = np.arange(K).reshape(1, 1, 1, 1, 1, K, 1)
    kw = np.arange(K).reshape(1, 1, 1, 1, 1, 1, K)
    d = po + kh - 1                                   # input-row offset from r_out*P
    ind = ((d // P == db - 1) & (d % P == pi) & (wo + kw - 1 == wi)).astype(np.float32)
    band = jnp.einsum("daubvhk,hkio->dauibvo", ind, wflip)   # (3,P,W,Cin,P,W,Cout)
    return band.reshape(K * P * W * Cin, P * W * Cout)


def _lane_tile(v, reps):
    """(C,) per-channel vector -> (1, reps*C) per-lane row matching the packed layout."""
    return jnp.tile(v, reps)[None, :].astype(jnp.float32)


def _bn_fold(ssum, ssq, gamma, beta, count, reps):
    """Training-mode BatchNorm (biased variance) folded into per-lane scale/shift rows.
    Note: var = E[x^2]-mean^2 in f32; fine at these sizes (Welford for huge N*H*W)."""
    C = gamma.shape[0]
    s = ssum.sum(axis=0).reshape(reps, C).sum(axis=0)
    q = ssq.sum(axis=0).reshape(reps, C).sum(axis=0)
    mean = s / count
    var = q / count - mean * mean
    scale = gamma * jax.lax.rsqrt(var + EPS)
    shift = beta - mean * scale
    return _lane_tile(scale, reps), _lane_tile(shift, reps)


# --------------------------------------------------------------------------------------
# Forward pass
# --------------------------------------------------------------------------------------
@jax.jit
def res_transpose_block(x_nchw, params):
    N, Cin, H, W = x_nchw.shape
    Cout = params["w1"].shape[1]
    assert Cin == Cout, "residual add requires in_channels == out_channels"
    P = _pick_pack(H, W, Cout)
    Hpk, L = H // P, P * W * Cin
    count = N * H * W

    # NCHW -> row-packed lane-dense layout (one relayout pass at the block boundary).
    # The residual path stays f32 so "+ x" is exact; the matmul casts to bf16 in-kernel.
    # TODO(synk): a caller keeping activations in this packed layout across blocks would
    # avoid the NCHW<->packed relayout passes entirely.
    x_rows = jnp.transpose(x_nchw, (0, 2, 3, 1)).reshape(N, Hpk, L)

    wb1 = _banded_weight(params["w1"], W, P).astype(jnp.bfloat16)
    wb2 = _banded_weight(params["w2"], W, P).astype(jnp.bfloat16)
    b1 = _lane_tile(params["b1"], P * W)
    b2 = _lane_tile(params["b2"], P * W)

    # Stage 1: conv1 + bias, per-batch BN1 statistics.
    z1, s1, q1 = _conv_bn_stats(x_rows, wb1, b1)
    scale1, shift1 = _bn_fold(s1, q1, params["g1"], params["beta1"], count, P * W)

    # Stage 2: BN1 affine + ReLU fused into conv2 (+ bias2, BN2 statistics); the
    # ReLU(BN1(conv1(x))) intermediate never round-trips through HBM.
    z2, s2, q2 = _conv_bn_stats(z1, wb2, b2, scale1, shift1)
    scale2, shift2 = _bn_fold(s2, q2, params["g2"], params["beta2"], count, P * W)

    # Stage 3: BN2 affine + residual add (output aliases the residual buffer).
    out = _affine_residual(z2, scale2, shift2, x_rows)

    # Packed layout -> NCHW.
    return jnp.transpose(out.reshape(N, Hpk, P, W, Cout),
                         (0, 4, 1, 2, 3)).reshape(N, Cout, H, W)


# --------------------------------------------------------------------------------------
# NumPy reference (PyTorch semantics: ConvTranspose2d + training-mode BatchNorm2d)
# --------------------------------------------------------------------------------------
def _np_conv_transpose(x, w, b):
    N, Cin, H, W = x.shape
    Cout = w.shape[1]
    full = np.zeros((N, Cout, H + 2, W + 2), np.float32)
    for n in range(N):
        for ci in range(Cin):
            for ih in range(H):
                for iw in range(W):
                    full[n, :, ih:ih + 3, iw:iw + 3] += x[n, ci, ih, iw] * w[ci]
    return full[:, :, 1:H + 1, 1:W + 1] + b[None, :, None, None]


def _np_bn(x, g, b):
    m = x.mean(axis=(0, 2, 3), keepdims=True)
    v = x.var(axis=(0, 2, 3), keepdims=True)          # biased variance (training mode)
    return (x - m) / np.sqrt(v + EPS) * g[None, :, None, None] + b[None, :, None, None]


def _np_ref(x, p):
    y = np.maximum(_np_bn(_np_conv_transpose(x, p["w1"], p["b1"]), p["g1"], p["beta1"]), 0.0)
    return _np_bn(_np_conv_transpose(y, p["w2"], p["b2"]), p["g2"], p["beta2"]) + x


# --------------------------------------------------------------------------------------
# main
# --------------------------------------------------------------------------------------
if __name__ == "__main__":
    key = jax.random.PRNGKey(0)
    ks = jax.random.split(key, 9)
    N, C, H, W = 2, 4, 16, 16
    x = jax.random.normal(ks[0], (N, C, H, W), jnp.float32)

    # ConvTranspose2d weight layout: (Cin, Cout, kH, kW).
    params = {
        "w1": 0.2 * jax.random.normal(ks[1], (C, C, K, K), jnp.float32),
        "b1": 0.1 * jax.random.normal(ks[2], (C,), jnp.float32),
        "g1": 1.0 + 0.1 * jax.random.normal(ks[3], (C,), jnp.float32),
        "beta1": 0.1 * jax.random.normal(ks[4], (C,), jnp.float32),
        "w2": 0.2 * jax.random.normal(ks[5], (C, C, K, K), jnp.float32),
        "b2": 0.1 * jax.random.normal(ks[6], (C,), jnp.float32),
        "g2": 1.0 + 0.1 * jax.random.normal(ks[7], (C,), jnp.float32),
        "beta2": 0.1 * jax.random.normal(ks[8], (C,), jnp.float32),
    }

    out = jax.block_until_ready(res_transpose_block(x, params))

    ref = _np_ref(np.asarray(x), {k: np.asarray(v) for k, v in params.items()})
    # bf16 activation/weight streams (f32 accumulation, f32 BN statistics, f32 residual)
    # -> slightly looser tolerance than a pure-f32 pipeline.
    np.testing.assert_allclose(np.asarray(out), ref, rtol=2e-2, atol=2e-2)
    print("KERNEL_OK")
</pallas_src>

<mosaic_0001>
module attributes {stable_mosaic.version = 11 : i64} {
  func.func @_conv_bn_stats_kernel(%arg0: i32, %arg1: memref<1x8x128xf32, #tpu.memory_space<vmem>>, %arg2: memref<384x128xbf16, #tpu.memory_space<vmem>>, %arg3: memref<1x128xf32, #tpu.memory_space<vmem>>, %arg4: memref<1x8x128xbf16, #tpu.memory_space<vmem>>, %arg5: memref<1x1x128xf32, #tpu.memory_space<vmem>>, %arg6: memref<1x1x128xf32, #tpu.memory_space<vmem>>) attributes {dimension_semantics = [#tpu.dimension_semantics<parallel>], iteration_bounds = array<i64: 2>, scalar_prefetch = 0 : i64, scratch_operands = 0 : i64, tpu.core_type = #tpu.core_type<tc>, window_params = [{transform_indices = @transform_0, window_bounds = array<i64: 1, 8, 128>}, {pipeline_mode = #tpu.pipeline_mode<synchronous>, transform_indices = @transform_1, window_bounds = array<i64: 384, 128>}, {pipeline_mode = #tpu.pipeline_mode<synchronous>, transform_indices = @transform_2, window_bounds = array<i64: 1, 128>}, {transform_indices = @transform_3, window_bounds = array<i64: 1, 8, 128>}, {transform_indices = @transform_4, window_bounds = array<i64: 1, 1, 128>}, {transform_indices = @transform_5, window_bounds = array<i64: 1, 1, 128>}]} {
    %c0 = arith.constant 0 : index
    %c0_0 = arith.constant 0 : index
    %c0_1 = arith.constant 0 : index
    %0 = vector.load %arg1[%c0, %c0_0, %c0_1] : memref<1x8x128xf32, #tpu.memory_space<vmem>>, vector<1x8x128xf32>
    %1 = vector.shape_cast %0 : vector<1x8x128xf32> to vector<8x128xf32>
    %cst = arith.constant 0.000000e+00 : f32
    %2 = vector.broadcast %cst : f32 to vector<1x128xf32>
    %3 = vector.extract_strided_slice %1 {offsets = [0, 0], sizes = [7, 128], strides = [1, 1]} : vector<8x128xf32> to vector<7x128xf32>
    %4 = tpu.concatenate %2, %3 in 0 : vector<1x128xf32>, vector<7x128xf32> -> vector<8x128xf32>
    %5 = vector.extract_strided_slice %1 {offsets = [1, 0], sizes = [7, 128], strides = [1, 1]} : vector<8x128xf32> to vector<7x128xf32>
    %6 = tpu.concatenate %5, %2 in 0 : vector<7x128xf32>, vector<1x128xf32> -> vector<8x128xf32>
    %7 = tpu.concatenate %4, %1, %6 in 1 : vector<8x128xf32>, vector<8x128xf32>, vector<8x128xf32> -> vector<8x384xf32>
    %8 = arith.truncf %7 : vector<8x384xf32> to vector<8x384xbf16>
    %c0_2 = arith.constant 0 : index
    %c0_3 = arith.constant 0 : index
    %9 = vector.load %arg2[%c0_2, %c0_3] : memref<384x128xbf16, #tpu.memory_space<vmem>>, vector<384x128xbf16>
    %cst_4 = arith.constant dense<0.000000e+00> : vector<8x128xf32>
    %10 = tpu.matmul %8, %9, %cst_4 {dimension_numbers = #tpu.dot_dimension_numbers<[1], [0], [0], [1], [0, 0, 1, 1], [], []>} : vector<8x384xbf16>, vector<384x128xbf16>, vector<8x128xf32> -> vector<8x128xf32>
    %c0_5 = arith.constant 0 : index
    %c0_6 = arith.constant 0 : index
    %11 = vector.load %arg3[%c0_5, %c0_6] : memref<1x128xf32, #tpu.memory_space<vmem>>, vector<1x128xf32>
    %12 = vector.broadcast %11 : vector<1x128xf32> to vector<8x128xf32>
    %13 = arith.addf %10, %12 : vector<8x128xf32>
    %14 = arith.truncf %13 : vector<8x128xf32> to vector<8x128xbf16>
    %c0_7 = arith.constant 0 : index
    %c0_8 = arith.constant 0 : index
    %c0_9 = arith.constant 0 : index
    %15 = vector.load %arg4[%c0_7, %c0_8, %c0_9] : memref<1x8x128xbf16, #tpu.memory_space<vmem>>, vector<1x8x128xbf16>
    %16 = vector.shape_cast %15 : vector<1x8x128xbf16> to vector<8x128xbf16>
    %17 = vector.shape_cast %14 : vector<8x128xbf16> to vector<1x8x128xbf16>
    tpu.vector_store %arg4[%c0_7, %c0_8, %c0_9], %17 {strides = array<i32>} : memref<1x8x128xbf16, #tpu.memory_space<vmem>>, vector<1x8x128xbf16>,
    %cst_10 = arith.constant dense<0.000000e+00> : vector<128xf32>
    %18 = vector.multi_reduction <add>, %13, %cst_10 [0] : vector<8x128xf32> to vector<128xf32>
    %19 = vector.shape_cast %18 : vector<128xf32> to vector<1x128xf32>
    %c0_11 = arith.constant 0 : index
    %c0_12 = arith.constant 0 : index
    %c0_13 = arith.constant 0 : index
    %20 = vector.load %arg5[%c0_11, %c0_12, %c0_13] : memref<1x1x128xf32, #tpu.memory_space<vmem>>, vector<1x1x128xf32>
    %21 = vector.shape_cast %20 : vector<1x1x128xf32> to vector<1x128xf32>
    %22 = vector.shape_cast %19 : vector<1x128xf32> to vector<1x1x128xf32>
    tpu.vector_store %arg5[%c0_11, %c0_12, %c0_13], %22 {strides = array<i32>} : memref<1x1x128xf32, #tpu.memory_space<vmem>>, vector<1x1x128xf32>,
    %23 = arith.mulf %13, %13 : vector<8x128xf32>
    %cst_14 = arith.constant dense<0.000000e+00> : vector<128xf32>
    %24 = vector.multi_reduction <add>, %23, %cst_14 [0] : vector<8x128xf32> to vector<128xf32>
    %25 = vector.shape_cast %24 : vector<128xf32> to vector<1x128xf32>
    %c0_15 = arith.constant 0 : index
    %c0_16 = arith.constant 0 : index
    %c0_17 = arith.constant 0 : index
    %26 = vector.load %arg6[%c0_15, %c0_16, %c0_17] : memref<1x1x128xf32, #tpu.memory_space<vmem>>, vector<1x1x128xf32>
    %27 = vector.shape_cast %26 : vector<1x1x128xf32> to vector<1x128xf32>
    %28 = vector.shape_cast %25 : vector<1x128xf32> to vector<1x1x128xf32>
    tpu.vector_store %arg6[%c0_15, %c0_16, %c0_17], %28 {strides = array<i32>} : memref<1x1x128xf32, #tpu.memory_space<vmem>>, vector<1x1x128xf32>,
    return
  }
  func.func @transform_0(%arg0: i32) -> (i32, i32, i32) {
    %c0_i32 = arith.constant 0 : i32
    %c0_i32_0 = arith.constant 0 : i32
    %c0_i32_1 = arith.constant 0 : i32
    return %arg0, %c0_i32, %c0_i32_0 : i32, i32, i32
  }
  func.func @transform_1(%arg0: i32) -> (i32, i32) {
    %c0_i32 = arith.constant 0 : i32
    %c0_i32_0 = arith.constant 0 : i32
    %c0_i32_1 = arith.constant 0 : i32
    return %c0_i32, %c0_i32_0 : i32, i32
  }
  func.func @transform_2(%arg0: i32) -> (i32, i32) {
    %c0_i32 = arith.constant 0 : i32
    %c0_i32_0 = arith.constant 0 : i32
    %c0_i32_1 = arith.constant 0 : i32
    return %c0_i32, %c0_i32_0 : i32, i32
  }
  func.func @transform_3(%arg0: i32) -> (i32, i32, i32) {
    %c0_i32 = arith.constant 0 : i32
    %c0_i32_0 = arith.constant 0 : i32
    %c0_i32_1 = arith.constant 0 : i32
    return %arg0, %c0_i32, %c0_i32_0 : i32, i32, i32
  }
  func.func @transform_4(%arg0: i32) -> (i32, i32, i32) {
    %c0_i32 = arith.constant 0 : i32
    %c0_i32_0 = arith.constant 0 : i32
    %c0_i32_1 = arith.constant 0 : i32
    return %arg0, %c0_i32, %c0_i32_0 : i32, i32, i32
  }
  func.func @transform_5(%arg0: i32) -> (i32, i32, i32) {
    %c0_i32 = arith.constant 0 : i32
    %c0_i32_0 = arith.constant 0 : i32
    %c0_i32_1 = arith.constant 0 : i32
    return %arg0, %c0_i32, %c0_i32_0 : i32, i32, i32
  }
}

module attributes {stable_mosaic.version = 11 : i64} {
  func.func @_conv_bn_stats_kernel(%arg0: i32, %arg1: memref<1x8x128xbf16, #tpu.memory_space<vmem>>, %arg2: memref<384x128xbf16, #tpu.memory_space<vmem>>, %arg3: memref<1x128xf32, #tpu.memory_space<vmem>>, %arg4: memref<1x128xf32, #tpu.memory_space<vmem>>, %arg5: memref<1x128xf32, #tpu.memory_space<vmem>>, %arg6: memref<1x8x128xbf16, #tpu.memory_space<vmem>>, %arg7: memref<1x1x128xf32, #tpu.memory_space<vmem>>, %arg8: memref<1x1x128xf32, #tpu.memory_space<vmem>>) attributes {dimension_semantics = [#tpu.dimension_semantics<parallel>], iteration_bounds = array<i64: 2>, scalar_prefetch = 0 : i64, scratch_operands = 0 : i64, tpu.core_type = #tpu.core_type<tc>, window_params = [{transform_indices = @transform_0, window_bounds = array<i64: 1, 8, 128>}, {pipeline_mode = #tpu.pipeline_mode<synchronous>, transform_indices = @transform_1, window_bounds = array<i64: 384, 128>}, {pipeline_mode = #tpu.pipeline_mode<synchronous>, transform_indices = @transform_2, window_bounds = array<i64: 1, 128>}, {pipeline_mode = #tpu.pipeline_mode<synchronous>, transform_indices = @transform_3, window_bounds = array<i64: 1, 128>}, {pipeline_mode = #tpu.pipeline_mode<synchronous>, transform_indices = @transform_4, window_bounds = array<i64: 1, 128>}, {transform_indices = @transform_5, window_bounds = array<i64: 1, 8, 128>}, {transform_indices = @transform_6, window_bounds = array<i64: 1, 1, 128>}, {transform_indices = @transform_7, window_bounds = array<i64: 1, 1, 128>}]} {
    %c0 = arith.constant 0 : index
    %c0_0 = arith.constant 0 : index
    %c0_1 = arith.constant 0 : index
    %0 = vector.load %arg1[%c0, %c0_0, %c0_1] : memref<1x8x128xbf16, #tpu.memory_space<vmem>>, vector<1x8x128xbf16>
    %1 = vector.shape_cast %0 : vector<1x8x128xbf16> to vector<8x128xbf16>
    %2 = arith.extf %1 : vector<8x128xbf16> to vector<8x128xf32>
    %c0_2 = arith.constant 0 : index
    %c0_3 = arith.constant 0 : index
    %3 = vector.load %arg4[%c0_2, %c0_3] : memref<1x128xf32, #tpu.memory_space<vmem>>, vector<1x128xf32>
    %4 = vector.broadcast %3 : vector<1x128xf32> to vector<8x128xf32>
    %5 = arith.mulf %2, %4 : vector<8x128xf32>
    %c0_4 = arith.constant 0 : index
    %c0_5 = arith.constant 0 : index
    %6 = vector.load %arg5[%c0_4, %c0_5] : memref<1x128xf32, #tpu.memory_space<vmem>>, vector<1x128xf32>
    %7 = vector.broadcast %6 : vector<1x128xf32> to vector<8x128xf32>
    %8 = arith.addf %5, %7 : vector<8x128xf32>
    %cst = arith.constant 0.000000e+00 : f32
    %9 = vector.broadcast %cst : f32 to vector<8x128xf32>
    %10 = arith.maximumf %8, %9 : vector<8x128xf32>
    %cst_6 = arith.constant 0.000000e+00 : f32
    %11 = vector.broadcast %cst_6 : f32 to vector<1x128xf32>
    %12 = vector.extract_strided_slice %10 {offsets = [0, 0], sizes = [7, 128], strides = [1, 1]} : vector<8x128xf32> to vector<7x128xf32>
    %13 = tpu.concatenate %11, %12 in 0 : vector<1x128xf32>, vector<7x128xf32> -> vector<8x128xf32>
    %14 = vector.extract_strided_slice %10 {offsets = [1, 0], sizes = [7, 128], strides = [1, 1]} : vector<8x128xf32> to vector<7x128xf32>
    %15 = tpu.concatenate %14, %11 in 0 : vector<7x128xf32>, vector<1x128xf32> -> vector<8x128xf32>
    %16 = tpu.concatenate %13, %10, %15 in 1 : vector<8x128xf32>, vector<8x128xf32>, vector<8x128xf32> -> vector<8x384xf32>
    %17 = arith.truncf %16 : vector<8x384xf32> to vector<8x384xbf16>
    %c0_7 = arith.constant 0 : index
    %c0_8 = arith.constant 0 : index
    %18 = vector.load %arg2[%c0_7, %c0_8] : memref<384x128xbf16, #tpu.memory_space<vmem>>, vector<384x128xbf16>
    %cst_9 = arith.constant dense<0.000000e+00> : vector<8x128xf32>
    %19 = tpu.matmul %17, %18, %cst_9 {dimension_numbers = #tpu.dot_dimension_numbers<[1], [0], [0], [1], [0, 0, 1, 1], [], []>} : vector<8x384xbf16>, vector<384x128xbf16>, vector<8x128xf32> -> vector<8x128xf32>
    %c0_10 = arith.constant 0 : index
    %c0_11 = arith.constant 0 : index
    %20 = vector.load %arg3[%c0_10, %c0_11] : memref<1x128xf32, #tpu.memory_space<vmem>>, vector<1x128xf32>
    %21 = vector.broadcast %20 : vector<1x128xf32> to vector<8x128xf32>
    %22 = arith.addf %19, %21 : vector<8x128xf32>
    %23 = arith.truncf %22 : vector<8x128xf32> to vector<8x128xbf16>
    %c0_12 = arith.constant 0 : index
    %c0_13 = arith.constant 0 : index
    %c0_14 = arith.constant 0 : index
    %24 = vector.load %arg6[%c0_12, %c0_13, %c0_14] : memref<1x8x128xbf16, #tpu.memory_space<vmem>>, vector<1x8x128xbf16>
    %25 = vector.shape_cast %24 : vector<1x8x128xbf16> to vector<8x128xbf16>
    %26 = vector.shape_cast %23 : vector<8x128xbf16> to vector<1x8x128xbf16>
    tpu.vector_store %arg6[%c0_12, %c0_13, %c0_14], %26 {strides = array<i32>} : memref<1x8x128xbf16, #tpu.memory_space<vmem>>, vector<1x8x128xbf16>,
    %cst_15 = arith.constant dense<0.000000e+00> : vector<128xf32>
    %27 = vector.multi_reduction <add>, %22, %cst_15 [0] : vector<8x128xf32> to vector<128xf32>
    %28 = vector.shape_cast %27 : vector<128xf32> to vector<1x128xf32>
    %c0_16 = arith.constant 0 : index
    %c0_17 = arith.constant 0 : index
    %c0_18 = arith.constant 0 : index
    %29 = vector.load %arg7[%c0_16, %c0_17, %c0_18] : memref<1x1x128xf32, #tpu.memory_space<vmem>>, vector<1x1x128xf32>
    %30 = vector.shape_cast %29 : vector<1x1x128xf32> to vector<1x128xf32>
    %31 = vector.shape_cast %28 : vector<1x128xf32> to vector<1x1x128xf32>
    tpu.vector_store %arg7[%c0_16, %c0_17, %c0_18], %31 {strides = array<i32>} : memref<1x1x128xf32, #tpu.memory_space<vmem>>, vector<1x1x128xf32>,
    %32 = arith.mulf %22, %22 : vector<8x128xf32>
    %cst_19 = arith.constant dense<0.000000e+00> : vector<128xf32>
    %33 = vector.multi_reduction <add>, %32, %cst_19 [0] : vector<8x128xf32> to vector<128xf32>
    %34 = vector.shape_cast %33 : vector<128xf32> to vector<1x128xf32>
    %c0_20 = arith.constant 0 : index
    %c0_21 = arith.constant 0 : index
    %c0_22 = arith.constant 0 : index
    %35 = vector.load %arg8[%c0_20, %c0_21, %c0_22] : memref<1x1x128xf32, #tpu.memory_space<vmem>>, vector<1x1x128xf32>
    %36 = vector.shape_cast %35 : vector<1x1x128xf32> to vector<1x128xf32>
    %37 = vector.shape_cast %34 : vector<1x128xf32> to vector<1x1x128xf32>
    tpu.vector_store %arg8[%c0_20, %c0_21, %c0_22], %37 {strides = array<i32>} : memref<1x1x128xf32, #tpu.memory_space<vmem>>, vector<1x1x128xf32>,
    return
  }
  func.func @transform_0(%arg0: i32) -> (i32, i32, i32) {
    %c0_i32 = arith.constant 0 : i32
    %c0_i32_0 = arith.constant 0 : i32
    %c0_i32_1 = arith.constant 0 : i32
    return %arg0, %c0_i32, %c0_i32_0 : i32, i32, i32
  }
  func.func @transform_1(%arg0: i32) -> (i32, i32) {
    %c0_i32 = arith.constant 0 : i32
    %c0_i32_0 = arith.constant 0 : i32
    %c0_i32_1 = arith.constant 0 : i32
    return %c0_i32, %c0_i32_0 : i32, i32
  }
  func.func @transform_2(%arg0: i32) -> (i32, i32) {
    %c0_i32 = arith.constant 0 : i32
    %c0_i32_0 = arith.constant 0 : i32
    %c0_i32_1 = arith.constant 0 : i32
    return %c0_i32, %c0_i32_0 : i32, i32
  }
  func.func @transform_3(%arg0: i32) -> (i32, i32) {
    %c0_i32 = arith.constant 0 : i32
    %c0_i32_0 = arith.constant 0 : i32
    %c0_i32_1 = arith.constant 0 : i32
    return %c0_i32, %c0_i32_0 : i32, i32
  }
  func.func @transform_4(%arg0: i32) -> (i32, i32) {
    %c0_i32 = arith.constant 0 : i32
    %c0_i32_0 = arith.constant 0 : i32
    %c0_i32_1 = arith.constant 0 : i32
    return %c0_i32, %c0_i32_0 : i32, i32
  }
  func.func @transform_5(%arg0: i32) -> (i32, i32, i32) {
    %c0_i32 = arith.constant 0 : i32
    %c0_i32_0 = arith.constant 0 : i32
    %c0_i32_1 = arith.constant 0 : i32
    return %arg0, %c0_i32, %c0_i32_0 : i32, i32, i32
  }
  func.func @transform_6(%arg0: i32) -> (i32, i32, i32) {
    %c0_i32 = arith.constant 0 : i32
    %c0_i32_0 = arith.constant 0 : i32
    %c0_i32_1 = arith.constant 0 : i32
    return %arg0, %c0_i32, %c0_i32_0 : i32, i32, i32
  }
  func.func @transform_7(%arg0: i32) -> (i32, i32, i32) {
    %c0_i32 = arith.constant 0 : i32
    %c0_i32_0 = arith.constant 0 : i32
    %c0_i32_1 = arith.constant 0 : i32
    return %arg0, %c0_i32, %c0_i32_0 : i32, i32, i32
  }
}

module attributes {stable_mosaic.version = 11 : i64} {
  func.func @_affine_residual_kernel(%arg0: i32, %arg1: memref<1x8x128xbf16, #tpu.memory_space<vmem>>, %arg2: memref<1x128xf32, #tpu.memory_space<vmem>>, %arg3: memref<1x128xf32, #tpu.memory_space<vmem>>, %arg4: memref<1x8x128xf32, #tpu.memory_space<vmem>>, %arg5: memref<1x8x128xf32, #tpu.memory_space<vmem>>) attributes {dimension_semantics = [#tpu.dimension_semantics<parallel>], iteration_bounds = array<i64: 2>, scalar_prefetch = 0 : i64, scratch_operands = 0 : i64, tpu.core_type = #tpu.core_type<tc>, window_params = [{transform_indices = @transform_0, window_bounds = array<i64: 1, 8, 128>}, {pipeline_mode = #tpu.pipeline_mode<synchronous>, transform_indices = @transform_1, window_bounds = array<i64: 1, 128>}, {pipeline_mode = #tpu.pipeline_mode<synchronous>, transform_indices = @transform_2, window_bounds = array<i64: 1, 128>}, {transform_indices = @transform_3, window_bounds = array<i64: 1, 8, 128>}, {transform_indices = @transform_4, window_bounds = array<i64: 1, 8, 128>}]} {
    %c0 = arith.constant 0 : index
    %c0_0 = arith.constant 0 : index
    %c0_1 = arith.constant 0 : index
    %0 = vector.load %arg1[%c0, %c0_0, %c0_1] : memref<1x8x128xbf16, #tpu.memory_space<vmem>>, vector<1x8x128xbf16>
    %1 = vector.shape_cast %0 : vector<1x8x128xbf16> to vector<8x128xbf16>
    %2 = arith.extf %1 : vector<8x128xbf16> to vector<8x128xf32>
    %c0_2 = arith.constant 0 : index
    %c0_3 = arith.constant 0 : index
    %3 = vector.load %arg2[%c0_2, %c0_3] : memref<1x128xf32, #tpu.memory_space<vmem>>, vector<1x128xf32>
    %4 = vector.broadcast %3 : vector<1x128xf32> to vector<8x128xf32>
    %5 = arith.mulf %2, %4 : vector<8x128xf32>
    %c0_4 = arith.constant 0 : index
    %c0_5 = arith.constant 0 : index
    %6 = vector.load %arg3[%c0_4, %c0_5] : memref<1x128xf32, #tpu.memory_space<vmem>>, vector<1x128xf32>
    %7 = vector.broadcast %6 : vector<1x128xf32> to vector<8x128xf32>
    %8 = arith.addf %5, %7 : vector<8x128xf32>
    %c0_6 = arith.constant 0 : index
    %c0_7 = arith.constant 0 : index
    %c0_8 = arith.constant 0 : index
    %9 = vector.load %arg4[%c0_6, %c0_7, %c0_8] : memref<1x8x128xf32, #tpu.memory_space<vmem>>, vector<1x8x128xf32>
    %10 = vector.shape_cast %9 : vector<1x8x128xf32> to vector<8x128xf32>
    %11 = arith.addf %8, %10 : vector<8x128xf32>
    %c0_9 = arith.constant 0 : index
    %c0_10 = arith.constant 0 : index
    %c0_11 = arith.constant 0 : index
    %12 = vector.load %arg5[%c0_9, %c0_10, %c0_11] : memref<1x8x128xf32, #tpu.memory_space<vmem>>, vector<1x8x128xf32>
    %13 = vector.shape_cast %12 : vector<1x8x128xf32> to vector<8x128xf32>
    %14 = vector.shape_cast %11 : vector<8x128xf32> to vector<1x8x128xf32>
    tpu.vector_store %arg5[%c0_9, %c0_10, %c0_11], %14 {strides = array<i32>} : memref<1x8x128xf32, #tpu.memory_space<vmem>>, vector<1x8x128xf32>,
    return
  }
  func.func @transform_0(%arg0: i32) -> (i32, i32, i32) {
    %c0_i32 = arith.constant 0 : i32
    %c0_i32_0 = arith.constant 0 : i32
    %c0_i32_1 = arith.constant 0 : i32
    return %arg0, %c0_i32, %c0_i32_0 : i32, i32, i32
  }
  func.func @transform_1(%arg0: i32) -> (i32, i32) {
    %c0_i32 = arith.constant 0 : i32
    %c0_i32_0 = arith.constant 0 : i32
    %c0_i32_1 = arith.constant 0 : i32
    return %c0_i32, %c0_i32_0 : i32, i32
  }
  func.func @transform_2(%arg0: i32) -> (i32, i32) {
    %c0_i32 = arith.constant 0 : i32
    %c0_i32_0 = arith.constant 0 : i32
    %c0_i32_1 = arith.constant 0 : i32
    return %c0_i32, %c0_i32_0 : i32, i32
  }
  func.func @transform_3(%arg0: i32) -> (i32, i32, i32) {
    %c0_i32 = arith.constant 0 : i32
    %c0_i32_0 = arith.constant 0 : i32
    %c0_i32_1 = arith.constant 0 : i32
    return %arg0, %c0_i32, %c0_i32_0 : i32, i32, i32
  }
  func.func @transform_4(%arg0: i32) -> (i32, i32, i32) {
    %c0_i32 = arith.constant 0 : i32
    %c0_i32_0 = arith.constant 0 : i32
    %c0_i32_1 = arith.constant 0 : i32
    return %arg0, %c0_i32, %c0_i32_0 : i32, i32, i32
  }
}

</mosaic_0001>

<bundles_post_ra>
// kernel: tile.33
= control target key start
LH: loop header
LB: loop body
LE: loop exit
PB: predicated region body
PF: predicated region fallthrough
CT: control target
= control target key end

     0   :  { %s40_s0 = inlined_call_operand.vmem [shape: f32[4], index: 0, kind: input, shape index: {}]   ;;  %s41_s1 = inlined_call_operand.vmem [shape: f32[32,4], index: 1, kind: output, shape index: {}]  }
   0x1   :  { %v4_v0 = vld [vmem:[%s40_s0] ss:$0 sm:$0xff] }
   0x2   :  { %5 = vst [vmem:[%s41_s1] sm:$0xff] %v4_v0 }
   0x3   :  { %12 = vst [vmem:[%s41_s1 + $0x8] sm:$0xff] %v4_v0 }
   0x4   :  { %13 = vst [vmem:[%s41_s1 + $0x10] sm:$0xff] %v4_v0 }
   0x5   :  { %14 = vst [vmem:[%s41_s1 + $0x18] sm:$0xff] %v4_v0 }

// kernel: tile.34
= control target key start
LH: loop header
LB: loop body
LE: loop exit
PB: predicated region body
PF: predicated region fallthrough
CT: control target
= control target key end

     0   :  { %s259_s10 = smov 124   ;;  %s260_s11 = smov 116   ;;  %vm3_vm0 = vcmask 31744   ;;  %vm9_vm1 = vcmask 1048544   ;;  %vm15_vm2 = vcmask 1015744   ;;  %vm21_vm3 = vcmask 982944   ;;  %s399_s0 = inlined_call_operand.vmem [shape: f32[32,4], index: 0, kind: input, shape index: {}]   ;;  %s400_s1 = inlined_call_operand.vmem [shape: f32[1,128], index: 1, kind: output, shape index: {}]  }
   0x1   :  { %v197_v0 = vld [vmem:[%s399_s0 + $0x1f] sm:$0x1]   ;;  %v199_v1 = vld [vmem:[%s399_s0 + $0x1d] sm:$0x1]   ;;  %v201_v2 = vld [vmem:[%s399_s0 + $0x1b] sm:$0x1]  }
   0x2   :  { %7 = vrot.lane.b32.xlu0 %v197_v0, %s259_s10  ;;  %19 = vrot.lane.b32.xlu1 %v199_v1, %s260_s11  ;;  %s261_s14 = smov 108   ;;  %v198_v3 = vld [vmem:[%s399_s0 + $0x1e] sm:$0x1]   ;;  %v200_v4 = vld [vmem:[%s399_s0 + $0x1c] sm:$0x1]   ;;  %s262_s19 = smov 120  }
   0x3   :  { %31 = vrot.lane.b32.xlu2 %v201_v2, %s261_s14  ;;  %s263_s20 = smov 112   ;;  %v202_v5 = vld [vmem:[%s399_s0 + $0x1a] sm:$0x1]   ;;  %s264_s23 = smov 104   ;;  %v203_v6 = vld [vmem:[%s399_s0 + $0x19] sm:$0x1]  }
   0x4   :  { %v204_v7 = vld [vmem:[%s399_s0 + $0x18] sm:$0x1]   ;;  %s265_s28 = smov 100   ;;  %s266_s29 = smov 96   ;;  %v205_v8 = vld [vmem:[%s399_s0 + $0x17] sm:$0x1]  }
   0x5   :  { %s267_s3 = smov 92   ;;  %v206_v9 = vld [vmem:[%s399_s0 + $0x16] sm:$0x1]   ;;  %v207_v10 = vld [vmem:[%s399_s0 + $0x15] sm:$0x1]   ;;  %s268_s8 = smov 88  }
   0x6   :  { %s269_s9 = smov 84   ;;  %v208_v11 = vld [vmem:[%s399_s0 + $0x14] sm:$0x1]   ;;  %s270_s12 = smov 80   ;;  %v209_v12 = vld [vmem:[%s399_s0 + $0x13] sm:$0x1]  }
   0x7   :  { %v210_v13 = vld [vmem:[%s399_s0 + $0x12] sm:$0x1]   ;;  %s271_s17 = smov 76   ;;  %s272_s18 = smov 72   ;;  %v211_v14 = vld [vmem:[%s399_s0 + $0x11] sm:$0x1]  }
   0x8   :  { %s273_s21 = smov 68   ;;  %v212_v15 = vld [vmem:[%s399_s0 + $0x10] sm:$0x1]   ;;  %v213_v16 = vld [vmem:[%s399_s0 + $0xf] sm:$0x1]   ;;  %s274_s26 = smov 64  }
   0x9   :  { %s275_s27 = smov 60   ;;  %v214_v17 = vld [vmem:[%s399_s0 + $0xe] sm:$0x1]   ;;  %s276_s30 = smov 56   ;;  %v215_v18 = vld [vmem:[%s399_s0 + $0xd] sm:$0x1]  }
   0xa   :  { %13 = vrot.lane.b32.xlu0 %v198_v3, %s262_s19  ;;  %25 = vrot.lane.b32.xlu1 %v200_v4, %s263_s20  ;;  %v216_v19 = vld [vmem:[%s399_s0 + $0xc] sm:$0x1]   ;;  %s277_s6 = smov 52   ;;  %s278_s7 = smov 48   ;;  %v217_v20 = vld [vmem:[%s399_s0 + $0xb] sm:$0x1]  }
   0xb   :  { %37 = vrot.lane.b32.xlu2 %v202_v5, %s264_s23  ;;  %s279_s10 = smov 44   ;;  %v218_v21 = vld [vmem:[%s399_s0 + $0xa] sm:$0x1]   ;;  %v219_v22 = vld [vmem:[%s399_s0 + $0x9] sm:$0x1]   ;;  %s280_s15 = smov 40  }
   0xc   :  { %s281_s16 = smov 36   ;;  %v220_v23 = vld [vmem:[%s399_s0 + $0x8] sm:$0x1]   ;;  %s282_s19 = smov 32   ;;  %v221_v24 = vld [vmem:[%s399_s0 + $0x7] sm:$0x1]  }
   0xd   :  { %v222_v25 = vld [vmem:[%s399_s0 + $0x6] sm:$0x1]   ;;  %s283_s24 = smov 28   ;;  %s284_s25 = smov 24   ;;  %v223_v26 = vld [vmem:[%s399_s0 + $0x5] sm:$0x1]  }
   0xe   :  { %v224_v27 = vld [vmem:[%s399_s0 + $0x4] sm:$0x1]   ;;  %v225_v28 = vld [vmem:[%s399_s0 + $0x3] sm:$0x1]   ;;  %s286_s4 = smov 16   ;;  %s287_s5 = smov 12  }
   0xf   :  { %v226_v29 = vld [vmem:[%s399_s0 + $0x2] sm:$0x1]   ;;  %v227_v30 = vld [vmem:[%s399_s0 + $0x1] sm:$0x1]   ;;  %s289_s11 = smov 4   ;;  %vm27_vm4 = vcmask 950144  }
  0x10   :  { %v2_v31 = vld [vmem:[%s399_s0] sm:$0x1]   ;;  %vm33_vm5 = vcmask 917344   ;;  %vm39_vm6 = vcmask 884544   ;;  %vm45_vm7 = vcmask 851744   ;;  %vm51_vm8 = vcmask 818944  }
  0x11   :  { %4 = vst.msk [vmem:[#allocation0] sm:$0x1] %vm3_vm0, %v2_v31   ;;  %vm57_vm9 = vcmask 786144   ;;  %vm63_vm10 = vcmask 753344   ;;  %vm69_vm11 = vcmask 720544   ;;  %vm75_vm12 = vcmask 687744  }
  0x12   :  { %43 = vrot.lane.b32.xlu0 %v203_v6, %s265_s28  ;;  %49 = vrot.lane.b32.xlu1 %v204_v7, %s266_s29  ;;  %s285_s28 = smov 20   ;;  %vm81_vm13 = vcmask 654944   ;;  %vm87_vm14 = vcmask 622144   ;;  %vm93_vm15 = vcmask 589344   ;;  %vm99_vm0 = vcmask 556544  }
  0x13   :  { %55 = vrot.lane.b32.xlu2 %v205_v8, %s267_s3 }
  0x1a   :  { %61 = vrot.lane.b32.xlu0 %v206_v9, %s268_s8  ;;  %67 = vrot.lane.b32.xlu1 %v207_v10, %s269_s9  ;;  %s288_s8 = smov 8  }
  0x1b   :  { %73 = vrot.lane.b32.xlu2 %v208_v11, %s270_s12 }
  0x22   :  { %79 = vrot.lane.b32.xlu0 %v209_v12, %s271_s17  ;;  %85 = vrot.lane.b32.xlu1 %v210_v13, %s272_s18 }
  0x23   :  { %91 = vrot.lane.b32.xlu2 %v211_v14, %s273_s21 }
  0x2a   :  { %97 = vrot.lane.b32.xlu0 %v212_v15, %s274_s26  ;;  %103 = vrot.lane.b32.xlu1 %v213_v16, %s275_s27 }
  0x2b   :  { %109 = vrot.lane.b32.xlu2 %v214_v17, %s276_s30 }
  0x32   :  { %115 = vrot.lane.b32.xlu0 %v215_v18, %s277_s6  ;;  %121 = vrot.lane.b32.xlu1 %v216_v19, %s278_s7 }
  0x33   :  { %127 = vrot.lane.b32.xlu2 %v217_v20, %s279_s10 }
  0x3a   :  { %133 = vrot.lane.b32.xlu0 %v218_v21, %s280_s15  ;;  %139 = vrot.lane.b32.xlu1 %v219_v22, %s281_s16 }
  0x3b   :  { %145 = vrot.lane.b32.xlu2 %v220_v23, %s282_s19 }
  0x42   :  { %151 = vrot.lane.b32.xlu0 %v221_v24, %s283_s24  ;;  %157 = vrot.lane.b32.xlu1 %v222_v25, %s284_s25 }
  0x43   :  { %163 = vrot.lane.b32.xlu2 %v223_v26, %s285_s28 }
  0x4a   :  { %169 = vrot.lane.b32.xlu0 %v224_v27, %s286_s4  ;;  %175 = vrot.lane.b32.xlu1 %v225_v28, %s287_s5 }
  0x4b   :  { %181 = vrot.lane.b32.xlu2 %v226_v29, %s288_s8 }
  0x52   :  { %187 = vrot.lane.b32.xlu0 %v227_v30, %s289_s11 }
  0x5d   :  { %v32_v32 = vpop.permute.xlu2 %31  }
  0x65   :  { %v38_v33 = vpop.permute.xlu2 %37  }
  0x6d   :  { %v56_v34 = vpop.permute.xlu2 %55  }
  0x74   :  { %v8_v35 = vpop.permute.xlu0 %7   ;;  %v20_v36 = vpop.permute.xlu1 %19  }
  0x75   :  { %10 = vst.msk [vmem:[#allocation0] sm:$0x1] %vm9_vm1, %v8_v35   ;;  %v74_v37 = vpop.permute.xlu2 %73   ;;  %vm105_vm1 = vcmask 523744  }
  0x7c   :  { %v14_v38 = vpop.permute.xlu0 %13   ;;  %v26_v39 = vpop.permute.xlu1 %25  }
  0x7d   :  { %16 = vst.msk [vmem:[#allocation0] sm:$0x1] %vm15_vm2, %v14_v38   ;;  %v92_v40 = vpop.permute.xlu2 %91   ;;  %vm111_vm2 = vcmask 490944  }
  0x7e   :  { %22 = vst.msk [vmem:[#allocation0] sm:$0x1] %vm21_vm3, %v20_v36   ;;  %vm117_vm3 = vcmask 458144  }
  0x7f   :  { %28 = vst.msk [vmem:[#allocation0] sm:$0x1] %vm27_vm4, %v26_v39   ;;  %vm123_vm4 = vcmask 425344  }
  0x80   :  { %34 = vst.msk [vmem:[#allocation0] sm:$0x1] %vm33_vm5, %v32_v32   ;;  %vm129_vm5 = vcmask 392544  }
  0x81   :  { %40 = vst.msk [vmem:[#allocation0] sm:$0x1] %vm39_vm6, %v38_v33   ;;  %vm135_vm6 = vcmask 359744  }
  0x84   :  { %v44_v41 = vpop.permute.xlu0 %43   ;;  %v50_v42 = vpop.permute.xlu1 %49  }
  0x85   :  { %46 = vst.msk [vmem:[#allocation0] sm:$0x1] %vm45_vm7, %v44_v41   ;;  %v110_v43 = vpop.permute.xlu2 %109   ;;  %vm141_vm7 = vcmask 326944  }
  0x86   :  { %52 = vst.msk [vmem:[#allocation0] sm:$0x1] %vm51_vm8, %v50_v42   ;;  %vm147_vm8 = vcmask 294144  }
  0x87   :  { %58 = vst.msk [vmem:[#allocation0] sm:$0x1] %vm57_vm9, %v56_v34   ;;  %vm153_vm9 = vcmask 261344  }
  0x8c   :  { %v62_v44 = vpop.permute.xlu0 %61   ;;  %v68_v45 = vpop.permute.xlu1 %67  }
  0x8d   :  { %64 = vst.msk [vmem:[#allocation0] sm:$0x1] %vm63_vm10, %v62_v44   ;;  %v128_v46 = vpop.permute.xlu2 %127   ;;  %vm159_vm10 = vcmask 228544  }
  0x8e   :  { %70 = vst.msk [vmem:[#allocation0] sm:$0x1] %vm69_vm11, %v68_v45   ;;  %vm165_vm11 = vcmask 195744  }
  0x8f   :  { %76 = vst.msk [vmem:[#allocation0] sm:$0x1] %vm75_vm12, %v74_v37   ;;  %vm171_vm12 = vcmask 162944  }
  0x94   :  { %v80_v47 = vpop.permute.xlu0 %79   ;;  %v86_v48 = vpop.permute.xlu1 %85  }
  0x95   :  { %82 = vst.msk [vmem:[#allocation0] sm:$0x1] %vm81_vm13, %v80_v47   ;;  %v146_v49 = vpop.permute.xlu2 %145   ;;  %vm177_vm13 = vcmask 130144  }
  0x96   :  { %88 = vst.msk [vmem:[#allocation0] sm:$0x1] %vm87_vm14, %v86_v48   ;;  %vm183_vm14 = vcmask 97344  }
  0x97   :  { %94 = vst.msk [vmem:[#allocation0] sm:$0x1] %vm93_vm15, %v92_v40   ;;  %vm189_vm15 = vcmask 64544  }
  0x9c   :  { %v98_v50 = vpop.permute.xlu0 %97   ;;  %v104_v51 = vpop.permute.xlu1 %103  }
  0x9d   :  { %100 = vst.msk [vmem:[#allocation0] sm:$0x1] %vm99_vm0, %v98_v50   ;;  %v164_v52 = vpop.permute.xlu2 %163  }
  0x9e   :  { %106 = vst.msk [vmem:[#allocation0] sm:$0x1] %vm105_vm1, %v104_v51  }
  0x9f   :  { %112 = vst.msk [vmem:[#allocation0] sm:$0x1] %vm111_vm2, %v110_v43  }
  0xa4   :  { %v116_v53 = vpop.permute.xlu0 %115   ;;  %v122_v54 = vpop.permute.xlu1 %121  }
  0xa5   :  { %118 = vst.msk [vmem:[#allocation0] sm:$0x1] %vm117_vm3, %v116_v53   ;;  %v182_v55 = vpop.permute.xlu2 %181  }
  0xa6   :  { %124 = vst.msk [vmem:[#allocation0] sm:$0x1] %vm123_vm4, %v122_v54  }
  0xa7   :  { %130 = vst.msk [vmem:[#allocation0] sm:$0x1] %vm129_vm5, %v128_v46  }
  0xac   :  { %v134_v56 = vpop.permute.xlu0 %133   ;;  %v140_v57 = vpop.permute.xlu1 %139  }
  0xad   :  { %136 = vst.msk [vmem:[#allocation0] sm:$0x1] %vm135_vm6, %v134_v56  }
  0xae   :  { %142 = vst.msk [vmem:[#allocation0] sm:$0x1] %vm141_vm7, %v140_v57  }
  0xaf   :  { %148 = vst.msk [vmem:[#allocation0] sm:$0x1] %vm147_vm8, %v146_v49  }
  0xb4   :  { %v152_v58 = vpop.permute.xlu0 %151   ;;  %v158_v59 = vpop.permute.xlu1 %157  }
  0xb5   :  { %154 = vst.msk [vmem:[#allocation0] sm:$0x1] %vm153_vm9, %v152_v58  }
  0xb6   :  { %160 = vst.msk [vmem:[#allocation0] sm:$0x1] %vm159_vm10, %v158_v59  }
  0xb7   :  { %166 = vst.msk [vmem:[#allocation0] sm:$0x1] %vm165_vm11, %v164_v52  }
  0xbc   :  { %v170_v60 = vpop.permute.xlu0 %169   ;;  %v176_v61 = vpop.permute.xlu1 %175  }
  0xbd   :  { %172 = vst.msk [vmem:[#allocation0] sm:$0x1] %vm171_vm12, %v170_v60  }
  0xbe   :  { %178 = vst.msk [vmem:[#allocation0] sm:$0x1] %vm177_vm13, %v176_v61  }
  0xbf   :  { %184 = vst.msk [vmem:[#allocation0] sm:$0x1] %vm183_vm14, %v182_v55  }
  0xc4   :  { %v188_v62 = vpop.permute.xlu0 %187  }
  0xc5   :  { %190 = vst.msk [vmem:[#allocation0] sm:$0x1] %vm189_vm15, %v188_v62  }
  0xcc   :  { %v193_v63 = vld [vmem:[#allocation0] sm:$0x1] }
  0xcd   :  { %196 = vst [vmem:[%s400_s1] sm:$0x1] %v193_v63 }

// kernel: res_transpose_block.3
= control target key start
LH: loop header
LB: loop body
LE: loop exit
PB: predicated region body
PF: predicated region fallthrough
CT: control target
= control target key end

     0   :  { %s789_s18 = smov 0   ;;  %s893_s0 = inlined_call_operand.vmem [shape: f32[2,8,128], index: 0, kind: input, shape index: {}]   ;;  %s894_s1 = inlined_call_operand.vmem [shape: bf16[384,128], index: 1, kind: input, shape index: {}]   ;;  %s895_s2 = inlined_call_operand.vmem [shape: f32[1,128], index: 2, kind: input, shape index: {}]   ;;  %s896_s3 = inlined_call_operand.vmem [shape: bf16[2,8,128], index: 3, kind: output, shape index: {0}]   ;;  %s897_s4 = inlined_call_operand.vmem [shape: f32[2,1,128], index: 4, kind: output, shape index: {1}]   ;;  %s898_s5 = inlined_call_operand.vmem [shape: f32[2,1,128], index: 5, kind: output, shape index: {2}]  }
   0x1 LB: > { %s605_s19 = sadd.s32 4294967295, %s757_s18   ;;  %p609_p0 = scmp.ge.s32.totalorder %s757_s18, 1  ;;  %s757_s18 = sphi %s789_s18, %s16_s18  }
   0x2   : > { %p191_p1 = scmp.lt.s32.totalorder %s757_s18, 3 }
   0x4   : > { %p192_p2 = pnand %p609_p0, %p191_p1 }
   0x5   : > { %p223_p3 = scmp.lt.s32.totalorder (!%p192_p2), %s605_s19, 1 }
   0x6   : > { %195 = sbr.rel (%p192_p2) target bundleno = 194 (0xc2), region = 32 }
   0xb   : > { %v725_v0 = vld [vmem:[%s894_s1 + $0x38] sm:$0xff]  ;;  %v724_v3 = vld [vmem:[%s894_s1 + $0x30] sm:$0xff]  ;;  %v723_v6 = vld [vmem:[%s894_s1 + $0x28] sm:$0xff]  ;;  %s900_s19 = smov (!%p223_p3, %s605_s19), 1  ;;  %vm241_vm0 = vcmask 1040384   ;;  %vm245_vm2 = vcmask 1046528  }
   0xc   : > { %v733_v1 = vld [vmem:[%s894_s1 + $0x78] sm:$0xff]  ;;  %446 = vmatpush.bf16.msra.mxu0 %v725_v0  ;;  %v732_v4 = vld [vmem:[%s894_s1 + $0x70] sm:$0xff]  ;;  %v731_v7 = vld [vmem:[%s894_s1 + $0x68] sm:$0xff]  ;;  %s610_s27 = sshll.u32 %s900_s19, 3  ;;  %s611_s28 = sshll.u32 %s900_s19, 2 }
   0xd   : > { %v741_v2 = vld [vmem:[%s894_s1 + $0xb8] sm:$0xff]  ;;  %459 = vmatpush.bf16.msra.mxu1 %v733_v1  ;;  %v740_v5 = vld [vmem:[%s894_s1 + $0xb0] sm:$0xff]  ;;  %v739_v8 = vld [vmem:[%s894_s1 + $0xa8] sm:$0xff]  ;;  %s226_s11 = scalar_lea.vmem %s893_s0, %s610_s27  ;;  %s230_s6 = scalar_lea.vmem %s896_s3, %s611_s28 }
   0xe   : > { %472 = vmatpush.bf16.msra.mxu2 %v741_v2  ;;  %v722_v9 = vld [vmem:[%s894_s1 + $0x20] sm:$0xff]  ;;  %v721_v12 = vld [vmem:[%s894_s1 + $0x18] sm:$0xff]  ;;  %v720_v15 = vld [vmem:[%s894_s1 + $0x10] sm:$0xff]  ;;  %s233_s9 = scalar_lea.vmem %s897_s4, %s900_s19  ;;  %s236_s12 = scalar_lea.vmem %s898_s5, %s900_s19 }
   0xf   : > { %v730_v10 = vld [vmem:[%s894_s1 + $0x60] sm:$0xff]  ;;  %v729_v13 = vld [vmem:[%s894_s1 + $0x58] sm:$0xff]  ;;  %v728_v16 = vld [vmem:[%s894_s1 + $0x50] sm:$0xff] }
  0x10   : > { %447 = vmatpush.bf16.msra.mxu0 %v724_v3  ;;  %v738_v11 = vld [vmem:[%s894_s1 + $0xa0] sm:$0xff]  ;;  %v737_v14 = vld [vmem:[%s894_s1 + $0x98] sm:$0xff]  ;;  %v736_v17 = vld [vmem:[%s894_s1 + $0x90] sm:$0xff] }
  0x11   : > { %460 = vmatpush.bf16.msra.mxu1 %v732_v4  ;;  %v719_v18 = vld [vmem:[%s894_s1 + $0x8] sm:$0xff]  ;;  %v237_v20 = vld [vmem:[%s226_s11] sm:$0xff]  ;;  %vm708_vm1 = vmneg %vm241_vm0 }
  0x12   : > { %473 = vmatpush.bf16.msra.mxu2 %v740_v5  ;;  %v727_v19 = vld [vmem:[%s894_s1 + $0x48] sm:$0xff]  ;;  %v239_v22 = vrot.slane %v237_v20, 7  ;;  %v718_v23 = vld [vmem:[%s894_s1] sm:$0xff]  ;;  %v243_v25 = vrot.slane %v237_v20, 1  ;;  %v248_v28 = vpack.c.bf16 %v237_v20, %v237_v20  ;;  %vm710_vm3 = vmpackc.low %vm708_vm1, %vm708_vm1 }
  0x13   : > { %v735_v21 = vld [vmem:[%s894_s1 + $0x88] sm:$0xff]  ;;  %v726_v24 = vld [vmem:[%s894_s1 + $0x40] sm:$0xff]  ;;  %vm713_vm4 = vmpackc.low %vm245_vm2, %vm245_vm2 }
  0x14   : > { %448 = vmatpush.bf16.msra.mxu0 %v723_v6  ;;  %v734_v26 = vld [vmem:[%s894_s1 + $0x80] sm:$0xff]  ;;  %v711_v27 = vpack.c.bf16 %v239_v22, %v239_v22  ;;  %v714_v29 = vpack.c.bf16 %v243_v25, %v243_v25 }
  0x15   : > { %461 = vmatpush.bf16.msra.mxu1 %v731_v7  ;;  %v750_v30 = vld [vmem:[%s895_s2] ss:$0 sm:$0xff] }
  0x16   : > { %474 = vmatpush.bf16.msra.mxu2 %v739_v8 }
  0x18   : > { %449 = vmatpush.bf16.msra.mxu0 %v722_v9 }
  0x19   : > { %462 = vmatpush.bf16.msra.mxu1 %v730_v10 }
  0x1a   : > { %475 = vmatpush.bf16.msra.mxu2 %v738_v11 }
  0x1c   : > { %450 = vmatpush.bf16.msra.mxu0 %v721_v12 }
  0x1d   : > { %463 = vmatpush.bf16.msra.mxu1 %v729_v13 }
  0x1e   : > { %476 = vmatpush.bf16.msra.mxu2 %v737_v14 }
  0x20   : > { %451 = vmatpush.bf16.msra.mxu0 %v720_v15 }
  0x21   : > { %464 = vmatpush.bf16.msra.mxu1 %v728_v16 }
  0x22   : > { %477 = vmatpush.bf16.msra.mxu2 %v736_v17 }
  0x24   : > { %452 = vmatpush.bf16.msra.mxu0 %v719_v18 }
  0x25   : > { %465 = vmatpush.bf16.msra.mxu1 %v727_v19 }
  0x26   : > { %478 = vmatpush.bf16.msra.mxu2 %v735_v21 }
  0x28   : > { %453 = vmatpush.bf16.msra.mxu0 %v718_v23 }
  0x29   : > { %466 = vmatpush.bf16.msra.mxu1 %v726_v24 }
  0x2a   : > { %479 = vmatpush.bf16.msra.mxu2 %v734_v26 }
  0x2b   : > { %712 = vmatmul.msk.bf16.vlgmr.msra.gmra.mxu0 %vm710_vm3, %v711_v27 }
  0x2c   : > { %467 = vmatmul.bf16.vlgmr.msra.gmra.mxu1 %v248_v28 }
  0x2d   : > { %715 = vmatmul.msk.bf16.vlgmr.msra.gmra.mxu2 %vm713_vm4, %v714_v29 }
  0xa8   : > { %v455_v31 = vpop.f32.mrf.mxu0 }
  0xa9   : > { %v468_v32 = vpop.f32.mrf.mxu1  ;;  %v456_v33 = vadd.f32 %v750_v30, %v455_v31 }
  0xab   : > { %v469_v34 = vadd.f32 %v468_v32, %v456_v33 }
  0xb0   : > { %v481_v35 = vpop.f32.mrf.mxu2  ;;  %v457_v37 = vpop.f32.mrf.mxu0 }
  0xb1   : > { %v482_v36 = vadd.f32 %v481_v35, %v469_v34  ;;  %v470_v38 = vpop.f32.mrf.mxu1 }
  0xb3   : > { %v485_v39 = vpack.c.bf16 %v482_v36, %v482_v36  ;;  %v487_v40 = vrot.slane %v482_v36, 4  ;;  %v494_v41 = vmul.f32 %v482_v36, %v482_v36 }
  0xb5   : > { %486 = vst [vmem:[%s230_s6] sm:$0xf] %v485_v39  ;;  %v488_v42 = vadd.f32 %v487_v40, %v482_v36  ;;  %v495_v43 = vrot.slane %v494_v41, 4 }
  0xb7   : > { %v489_v44 = vrot.slane %v488_v42, 2  ;;  %v496_v45 = vadd.f32 %v495_v43, %v494_v41 }
  0xb8   : > { %v483_v46 = vpop.f32.mrf.mxu2 }
  0xb9   : > { %v490_v47 = vadd.f32 %v489_v44, %v488_v42  ;;  %v497_v48 = vrot.slane %v496_v45, 2 }
  0xbb   : > { %v491_v49 = vrot.slane %v490_v47, 1  ;;  %v498_v50 = vadd.f32 %v497_v48, %v496_v45 }
  0xbd   : > { %v492_v51 = vadd.f32 %v491_v49, %v490_v47  ;;  %v499_v52 = vrot.slane %v498_v50, 1 }
  0xbf   : > { %493 = vst [vmem:[%s233_s9] sm:$0x1] %v492_v51  ;;  %v500_v53 = vadd.f32 %v499_v52, %v498_v50 }
  0xc1   : > { %501 = vst [vmem:[%s236_s12] sm:$0x1] %v500_v53 }
  0xc2 PF: > { %s16_s18 = sadd.s32 1, %s757_s18  }
  0xc3   : > { %p13_p4 = scmp.ge.s32.totalorder %s16_s18, 4  }
  0xc5   :  { %15 = sbr.rel (!%p13_p4) target bundleno = 1 (0x1), region = 86 }

// kernel: res_transpose_block.4
= control target key start
LH: loop header
LB: loop body
LE: loop exit
PB: predicated region body
PF: predicated region fallthrough
CT: control target
= control target key end

     0   :  { %s867_s24 = smov 0   ;;  %s980_s0 = inlined_call_operand.vmem [shape: bf16[2,8,128], index: 0, kind: input, shape index: {}]   ;;  %s981_s1 = inlined_call_operand.vmem [shape: bf16[384,128], index: 1, kind: input, shape index: {}]   ;;  %s982_s2 = inlined_call_operand.vmem [shape: f32[1,128], index: 2, kind: input, shape index: {}]   ;;  %s983_s3 = inlined_call_operand.vmem [shape: f32[1,128], index: 3, kind: input, shape index: {}]   ;;  %s984_s4 = inlined_call_operand.vmem [shape: f32[1,128], index: 4, kind: input, shape index: {}]   ;;  %s985_s5 = inlined_call_operand.vmem [shape: bf16[2,8,128], index: 5, kind: output, shape index: {0}]   ;;  %s986_s6 = inlined_call_operand.vmem [shape: f32[2,1,128], index: 6, kind: output, shape index: {1}]   ;;  %s987_s7 = inlined_call_operand.vmem [shape: f32[2,1,128], index: 7, kind: output, shape index: {2}]  }
   0x1 LB: > { %s671_s25 = sadd.s32 4294967295, %s825_s24   ;;  %p675_p0 = scmp.ge.s32.totalorder %s825_s24, 1  ;;  %s825_s24 = sphi %s867_s24, %s18_s24  }
   0x2   : > { %p241_p1 = scmp.lt.s32.totalorder %s825_s24, 3 }
   0x4   : > { %p242_p2 = pnand %p675_p0, %p241_p1 }
   0x5   : > { %p277_p3 = scmp.lt.s32.totalorder (!%p242_p2), %s671_s25, 1 }
   0x6   : > { %245 = sbr.rel (%p242_p2) target bundleno = 194 (0xc2), region = 40 }
   0xb   : > { %v791_v0 = vld [vmem:[%s981_s1 + $0x38] sm:$0xff]  ;;  %v790_v3 = vld [vmem:[%s981_s1 + $0x30] sm:$0xff]  ;;  %s989_s25 = smov (!%p277_p3, %s671_s25), 1  ;;  %v789_v6 = vld [vmem:[%s981_s1 + $0x28] sm:$0xff]  ;;  %vm307_vm0 = vcmask 1040384   ;;  %vm311_vm2 = vcmask 1046528  }
   0xc   : > { %v799_v1 = vld [vmem:[%s981_s1 + $0x78] sm:$0xff]  ;;  %512 = vmatpush.bf16.msra.mxu0 %v791_v0  ;;  %v798_v4 = vld [vmem:[%s981_s1 + $0x70] sm:$0xff]  ;;  %s676_s15 = sshll.u32 %s989_s25, 2  ;;  %v797_v7 = vld [vmem:[%s981_s1 + $0x68] sm:$0xff]  ;;  %s287_s28 = scalar_lea.vmem %s986_s6, %s989_s25 }
   0xd   : > { %v807_v2 = vld [vmem:[%s981_s1 + $0xb8] sm:$0xff]  ;;  %525 = vmatpush.bf16.msra.mxu1 %v799_v1  ;;  %v806_v5 = vld [vmem:[%s981_s1 + $0xb0] sm:$0xff]  ;;  %s280_s18 = scalar_lea.vmem %s980_s0, %s676_s15  ;;  %v805_v8 = vld [vmem:[%s981_s1 + $0xa8] sm:$0xff]  ;;  %s284_s23 = scalar_lea.vmem %s985_s5, %s676_s15 }
   0xe   : > { %538 = vmatpush.bf16.msra.mxu2 %v807_v2  ;;  %v291_v9 = vld [vmem:[%s280_s18] sm:$0xf]  ;;  %v787_v17 = vld [vmem:[%s981_s1 + $0x18] sm:$0xff]  ;;  %v786_v21 = vld [vmem:[%s981_s1 + $0x10] sm:$0xff]  ;;  %s290_s30 = scalar_lea.vmem %s987_s7, %s989_s25 }
   0xf   : > { %v292_v10 = vunpack.c.l.bf16 %v291_v9  ;;  %v816_v11 = vld [vmem:[%s983_s3] ss:$0 sm:$0xff]  ;;  %v795_v18 = vld [vmem:[%s981_s1 + $0x58] sm:$0xff]  ;;  %v794_v22 = vld [vmem:[%s981_s1 + $0x50] sm:$0xff] }
  0x10   : > { %513 = vmatpush.bf16.msra.mxu0 %v790_v3  ;;  %v788_v12 = vld [vmem:[%s981_s1 + $0x20] sm:$0xff]  ;;  %v803_v19 = vld [vmem:[%s981_s1 + $0x98] sm:$0xff]  ;;  %v802_v23 = vld [vmem:[%s981_s1 + $0x90] sm:$0xff] }
  0x11   : > { %526 = vmatpush.bf16.msra.mxu1 %v798_v4  ;;  %v796_v13 = vld [vmem:[%s981_s1 + $0x60] sm:$0xff]  ;;  %v297_v15 = vmul.f32 %v816_v11, %v292_v10  ;;  %v785_v25 = vld [vmem:[%s981_s1 + $0x8] sm:$0xff]  ;;  %vm774_vm1 = vmneg %vm307_vm0 }
  0x12   : > { %539 = vmatpush.bf16.msra.mxu2 %v806_v5  ;;  %v804_v14 = vld [vmem:[%s981_s1 + $0xa0] sm:$0xff]  ;;  %v793_v26 = vld [vmem:[%s981_s1 + $0x48] sm:$0xff]  ;;  %vm776_vm3 = vmpackc.low %vm774_vm1, %vm774_vm1 }
  0x13   : > { %v817_v16 = vld [vmem:[%s984_s4] ss:$0 sm:$0xff]  ;;  %v801_v27 = vld [vmem:[%s981_s1 + $0x88] sm:$0xff]  ;;  %vm779_vm4 = vmpackc.low %vm311_vm2, %vm311_vm2 }
  0x14   : > { %514 = vmatpush.bf16.msra.mxu0 %v789_v6  ;;  %v302_v20 = vadd.f32 %v817_v16, %v297_v15  ;;  %v784_v29 = vld [vmem:[%s981_s1] sm:$0xff] }
  0x15   : > { %527 = vmatpush.bf16.msra.mxu1 %v797_v7  ;;  %v792_v30 = vld [vmem:[%s981_s1 + $0x40] sm:$0xff] }
  0x16   : > { %540 = vmatpush.bf16.msra.mxu2 %v805_v8  ;;  %v303_v24 = vmax.f32 %v302_v20, 0.0  ;;  %v800_v32 = vld [vmem:[%s981_s1 + $0x80] sm:$0xff] }
  0x17   : > { %v818_v36 = vld [vmem:[%s982_s2] ss:$0 sm:$0xff] }
  0x18   : > { %515 = vmatpush.bf16.msra.mxu0 %v788_v12  ;;  %v305_v28 = vrot.slane %v303_v24, 7  ;;  %v309_v31 = vrot.slane %v303_v24, 1  ;;  %v314_v34 = vpack.c.bf16 %v303_v24, %v303_v24 }
  0x19   : > { %528 = vmatpush.bf16.msra.mxu1 %v796_v13 }
  0x1a   : > { %541 = vmatpush.bf16.msra.mxu2 %v804_v14  ;;  %v777_v33 = vpack.c.bf16 %v305_v28, %v305_v28  ;;  %v780_v35 = vpack.c.bf16 %v309_v31, %v309_v31 }
  0x1c   : > { %516 = vmatpush.bf16.msra.mxu0 %v787_v17 }
  0x1d   : > { %529 = vmatpush.bf16.msra.mxu1 %v795_v18 }
  0x1e   : > { %542 = vmatpush.bf16.msra.mxu2 %v803_v19 }
  0x20   : > { %517 = vmatpush.bf16.msra.mxu0 %v786_v21 }
  0x21   : > { %530 = vmatpush.bf16.msra.mxu1 %v794_v22 }
  0x22   : > { %543 = vmatpush.bf16.msra.mxu2 %v802_v23 }
  0x24   : > { %518 = vmatpush.bf16.msra.mxu0 %v785_v25 }
  0x25   : > { %531 = vmatpush.bf16.msra.mxu1 %v793_v26 }
  0x26   : > { %544 = vmatpush.bf16.msra.mxu2 %v801_v27 }
  0x28   : > { %519 = vmatpush.bf16.msra.mxu0 %v784_v29 }
  0x29   : > { %532 = vmatpush.bf16.msra.mxu1 %v792_v30 }
  0x2a   : > { %545 = vmatpush.bf16.msra.mxu2 %v800_v32 }
  0x2b   : > { %778 = vmatmul.msk.bf16.vlgmr.msra.gmra.mxu0 %vm776_vm3, %v777_v33 }
  0x2c   : > { %533 = vmatmul.bf16.vlgmr.msra.gmra.mxu1 %v314_v34 }
  0x2d   : > { %781 = vmatmul.msk.bf16.vlgmr.msra.gmra.mxu2 %vm779_vm4, %v780_v35 }
  0xa8   : > { %v521_v37 = vpop.f32.mrf.mxu0 }
  0xa9   : > { %v534_v38 = vpop.f32.mrf.mxu1  ;;  %v522_v39 = vadd.f32 %v818_v36, %v521_v37 }
  0xab   : > { %v535_v40 = vadd.f32 %v534_v38, %v522_v39 }
  0xb0   : > { %v547_v41 = vpop.f32.mrf.mxu2  ;;  %v523_v43 = vpop.f32.mrf.mxu0 }
  0xb1   : > { %v548_v42 = vadd.f32 %v547_v41, %v535_v40  ;;  %v536_v44 = vpop.f32.mrf.mxu1 }
  0xb3   : > { %v551_v45 = vpack.c.bf16 %v548_v42, %v548_v42  ;;  %v553_v46 = vrot.slane %v548_v42, 4  ;;  %v560_v47 = vmul.f32 %v548_v42, %v548_v42 }
  0xb5   : > { %552 = vst [vmem:[%s284_s23] sm:$0xf] %v551_v45  ;;  %v554_v48 = vadd.f32 %v553_v46, %v548_v42  ;;  %v561_v49 = vrot.slane %v560_v47, 4 }
  0xb7   : > { %v555_v50 = vrot.slane %v554_v48, 2  ;;  %v562_v51 = vadd.f32 %v561_v49, %v560_v47 }
  0xb8   : > { %v549_v52 = vpop.f32.mrf.mxu2 }
  0xb9   : > { %v556_v53 = vadd.f32 %v555_v50, %v554_v48  ;;  %v563_v54 = vrot.slane %v562_v51, 2 }
  0xbb   : > { %v557_v55 = vrot.slane %v556_v53, 1  ;;  %v564_v56 = vadd.f32 %v563_v54, %v562_v51 }
  0xbd   : > { %v558_v57 = vadd.f32 %v557_v55, %v556_v53  ;;  %v565_v58 = vrot.slane %v564_v56, 1 }
  0xbf   : > { %559 = vst [vmem:[%s287_s28] sm:$0x1] %v558_v57  ;;  %v566_v59 = vadd.f32 %v565_v58, %v564_v56 }
  0xc1   : > { %567 = vst [vmem:[%s290_s30] sm:$0x1] %v566_v59 }
  0xc2 PF: > { %s18_s24 = sadd.s32 1, %s825_s24  }
  0xc3   : > { %p15_p4 = scmp.ge.s32.totalorder %s18_s24, 4  }
  0xc5   :  { %17 = sbr.rel (!%p15_p4) target bundleno = 1 (0x1), region = 94 }

// kernel: res_transpose_block.5
= control target key start
LH: loop header
LB: loop body
LE: loop exit
PB: predicated region body
PF: predicated region fallthrough
CT: control target
= control target key end

     0   :  { %s314_s15 = smov 0   ;;  %s358_s0 = inlined_call_operand.vmem [shape: bf16[2,8,128], index: 0, kind: input, shape index: {}]   ;;  %s359_s1 = inlined_call_operand.vmem [shape: f32[1,128], index: 1, kind: input, shape index: {}]   ;;  %s360_s2 = inlined_call_operand.vmem [shape: f32[1,128], index: 2, kind: input, shape index: {}]   ;;  %s361_s3 = inlined_call_operand.vmem [shape: f32[2,8,128], index: 3, kind: input, shape index: {}, may-alias: {3,4}]   ;;  %s362_s4 = inlined_call_operand.vmem [shape: f32[2,8,128], index: 4, kind: output, shape index: {}, may-alias: {3,4}]  }
   0x1 LB: > { %s290_s16 = sadd.s32 4294967295, %s316_s15   ;;  %p294_p0 = scmp.ge.s32.totalorder %s316_s15, 1  ;;  %s316_s15 = sphi %s314_s15, %s14_s15  }
   0x2   : > { %p170_p1 = scmp.lt.s32.totalorder %s316_s15, 3 }
   0x4   : > { %p171_p2 = pnand %p294_p0, %p170_p1 }
   0x5   : > { %p198_p3 = scmp.lt.s32.totalorder (!%p171_p2), %s290_s16, 1 }
   0x6   : > { %174 = sbr.rel (%p171_p2) target bundleno = 24 (0x18), region = 36 }
   0xb   : > { %s364_s16 = smov (!%p198_p3, %s290_s16), 1  ;;  %v308_v0 = vld [vmem:[%s359_s1] ss:$0 sm:$0xff] }
   0xc   : > { %s295_s17 = sshll.u32 %s364_s16, 2  ;;  %s296_s18 = sshll.u32 %s364_s16, 3  ;;  %v309_v3 = vld [vmem:[%s360_s2] ss:$0 sm:$0xff] }
   0xd   : > { %s201_s21 = scalar_lea.vmem %s358_s0, %s295_s17  ;;  %s205_s26 = scalar_lea.vmem %s361_s3, %s296_s18 }
   0xe   : > { %v210_v1 = vld [vmem:[%s201_s21] sm:$0xf]  ;;  %s209_s5 = scalar_lea.vmem %s362_s4, %s296_s18 }
   0xf   : > { %v211_v2 = vunpack.c.l.bf16 %v210_v1  ;;  %v222_v5 = vld [vmem:[%s205_s26] sm:$0xff] }
  0x11   : > { %v216_v4 = vmul.f32 %v308_v0, %v211_v2 }
  0x13   : > { %v221_v6 = vadd.f32 %v309_v3, %v216_v4 }
  0x15   : > { %v223_v7 = vadd.f32 %v222_v5, %v221_v6 }
  0x17   : > { %224 = vst [vmem:[%s209_s5] sm:$0xff] %v223_v7 }
  0x18 PF: > { %s14_s15 = sadd.s32 1, %s316_s15  }
  0x19   : > { %p11_p4 = scmp.ge.s32.totalorder %s14_s15, 4  }
  0x1b   :  { %13 = sbr.rel (!%p11_p4) target bundleno = 1 (0x1), region = 69 }

</bundles_post_ra>
